<compile_context>
chip_gen: v7x
topology: tpu7x:2x2x1
jax: 0.10.0
libtpu: 0.0.40
codegen_flags: <defaults>
</compile_context>

<pallas_src>
import functools

import jax
import jax.numpy as jnp
from jax import lax
from jax.experimental import pallas as pl
from jax.experimental.pallas import tpu as pltpu


def _round_up(v, m):
    return (v + m - 1) // m * m


def gcn_kernel(x_ref, adj_ref, w1_ref, w2_ref, out_ref, *, n_nodes, n_pad):
    # x:   [Np, Dip]   bf16   (padded node x input-feature)
    # adj: [Np, Np]    bf16   (lane-dense: Np is a multiple of 128)
    # w1:  [Dip, Hp]   bf16
    # w2:  [Hp, Dop]   bf16
    # out: [8, Dop]    f32    (row 0 = mean pool, row 1 = max pool, rows 2..7
    #                          replicate max and are never read by the wrapper)
    x = x_ref[...]
    adj = adj_ref[...]
    w1 = w1_ref[...]
    w2 = w2_ref[...]

    # GCN layer 1: tanh((adj @ x) @ w1) — bf16 MXU operands, f32 accumulate.
    ax = jnp.dot(adj, x, preferred_element_type=jnp.float32)
    h1 = jnp.tanh(
        jnp.dot(ax.astype(jnp.bfloat16), w1, preferred_element_type=jnp.float32)
    )

    # GCN layer 2: tanh((adj @ h1) @ w2)
    ah = jnp.dot(adj, h1.astype(jnp.bfloat16), preferred_element_type=jnp.float32)
    h2 = jnp.tanh(
        jnp.dot(ah.astype(jnp.bfloat16), w2, preferred_element_type=jnp.float32)
    )

    # Pool over the true node rows only. Padded rows of h2 are tanh(0) = 0 and
    # would corrupt max (all-negative features) and skew mean if included.
    # The mask is skipped entirely (trace-time check) when no padding exists.
    if n_nodes == n_pad:
        sum_pool = jnp.sum(h2, axis=0, keepdims=True)                 # [1, Dop]
        max_pool = jnp.max(h2, axis=0, keepdims=True)                 # [1, Dop]
    else:
        row_ids = lax.broadcasted_iota(jnp.int32, h2.shape, 0)
        valid = row_ids < n_nodes
        sum_pool = jnp.sum(jnp.where(valid, h2, 0.0), axis=0, keepdims=True)
        max_pool = jnp.max(jnp.where(valid, h2, -jnp.inf), axis=0, keepdims=True)
    mean_pool = sum_pool * (1.0 / float(n_nodes))

    # Lane-dense (8, Dop) slab, single select: row 0 = mean, rows 1..7 = max.
    out_rows = lax.broadcasted_iota(jnp.int32, out_ref.shape, 0)
    out_ref[...] = jnp.where(out_rows == 0, mean_pool, max_pool)


def make_gcn(w1, w2):
    """Prepare padded bf16 weights once; return a jitted forward(x, adj)."""
    d_in, hidden = w1.shape
    hidden2, d_out = w2.shape
    assert hidden2 == hidden

    # Feature axes padded to the 128-lane boundary (done ONCE, off the hot path).
    d_in_p = _round_up(d_in, 128)
    h_p = _round_up(hidden, 128)
    d_out_p = _round_up(d_out, 128)

    w1_p = jnp.pad(w1, ((0, d_in_p - d_in), (0, h_p - hidden))).astype(jnp.bfloat16)
    w2_p = jnp.pad(w2, ((0, h_p - hidden), (0, d_out_p - d_out))).astype(jnp.bfloat16)

    @jax.jit
    def forward(x, adj):
        n = x.shape[0]
        assert n > 0, "GCN pooling requires at least one node"
        assert x.shape == (n, d_in)
        assert adj.shape == (n, n)

        # Node axis padded to 128: lane-dense adj columns for the MXU and a
        # multiple of the bf16 (16,128) sublane packing. Padded entries are
        # zero, so the f32-accumulated matmuls are unchanged.
        n_p = _round_up(n, 128)

        x_p = jnp.pad(x, ((0, n_p - n), (0, d_in_p - d_in))).astype(jnp.bfloat16)
        adj_p = jnp.pad(adj, ((0, n_p - n), (0, n_p - n))).astype(jnp.bfloat16)

        kernel = functools.partial(gcn_kernel, n_nodes=n, n_pad=n_p)

        out = pl.pallas_call(
            kernel,
            out_shape=jax.ShapeDtypeStruct((8, d_out_p), jnp.float32),
            in_specs=[
                pl.BlockSpec(memory_space=pltpu.MemorySpace.VMEM),
                pl.BlockSpec(memory_space=pltpu.MemorySpace.VMEM),
                pl.BlockSpec(memory_space=pltpu.MemorySpace.VMEM),
                pl.BlockSpec(memory_space=pltpu.MemorySpace.VMEM),
            ],
            out_specs=pl.BlockSpec(memory_space=pltpu.MemorySpace.VMEM),
            # Whole-resident design: adj [Np,Np] bf16 + x/w1/w2 must fit VMEM.
            # 32 MiB cap keeps the same ceiling on v5e/v6e/v7x (v7x physical
            # VMEM is only 64 MiB); scale N past ~4K and the tiled design in
            # the TODO is required instead.
            compiler_params=pltpu.CompilerParams(
                vmem_limit_bytes=32 * 1024 * 1024
            ),
        )(x_p, adj_p, w1_p, w2_p)

        # Wrapper-side layout plumbing (fused under jit): strip feature
        # padding and concat (mean, max) like torch.cat((avg, max), dim=-1).
        return jnp.concatenate((out[0, :d_out], out[1, :d_out]), axis=-1)

    return forward


def gcn_reference_bf16(x, adj, w1, w2):
    """Reference with identical numerics (bf16 MXU operands, f32 accumulate)."""
    bf, f32 = jnp.bfloat16, jnp.float32
    ax = jnp.dot(adj.astype(bf), x.astype(bf), preferred_element_type=f32)
    h1 = jnp.tanh(jnp.dot(ax.astype(bf), w1.astype(bf), preferred_element_type=f32))
    ah = jnp.dot(adj.astype(bf), h1.astype(bf), preferred_element_type=f32)
    h2 = jnp.tanh(jnp.dot(ah.astype(bf), w2.astype(bf), preferred_element_type=f32))
    return jnp.concatenate((jnp.mean(h2, axis=0), jnp.max(h2, axis=0)), axis=-1)


if __name__ == "__main__":
    key = jax.random.PRNGKey(0)
    k_x, k_adj, k_w1, k_w2 = jax.random.split(key, 4)

    # Small shapes consistent with the module: N nodes, input/hidden/output dims.
    N, INPUT_DIM, HIDDEN_DIM, OUTPUT_DIM = 8, 16, 32, 16

    x = jax.random.normal(k_x, (N, INPUT_DIM), dtype=jnp.float32)
    adj = jax.random.uniform(k_adj, (N, N), dtype=jnp.float32)

    # Deterministic parameter init (torch.randn analog).
    w1 = jax.random.normal(k_w1, (INPUT_DIM, HIDDEN_DIM), dtype=jnp.float32)
    w2 = jax.random.normal(k_w2, (HIDDEN_DIM, OUTPUT_DIM), dtype=jnp.float32)

    # One-time weight prep + jitted forward (hot path only pads/casts x, adj).
    gcn = make_gcn(w1, w2)
    out = jax.block_until_ready(gcn(x, adj))

    ref = gcn_reference_bf16(x, adj, w1, w2)
    assert out.shape == (2 * OUTPUT_DIM,)
    assert jnp.allclose(out, ref, atol=2e-3, rtol=2e-3), float(
        jnp.max(jnp.abs(out - ref))
    )

    print("KERNEL_OK")
</pallas_src>

<mosaic_0001>
module attributes {stable_mosaic.version = 11 : i64} {
  func.func @gcn_kernel(%arg0: memref<128x128xbf16, #tpu.memory_space<vmem>>, %arg1: memref<128x128xbf16, #tpu.memory_space<vmem>>, %arg2: memref<128x128xbf16, #tpu.memory_space<vmem>>, %arg3: memref<128x128xbf16, #tpu.memory_space<vmem>>, %arg4: memref<8x128xf32, #tpu.memory_space<vmem>>) attributes {dimension_semantics = [], scalar_prefetch = 0 : i64, scratch_operands = 0 : i64, tpu.core_type = #tpu.core_type<tc>} {
    %c0 = arith.constant 0 : index
    %c0_0 = arith.constant 0 : index
    %0 = vector.load %arg0[%c0, %c0_0] : memref<128x128xbf16, #tpu.memory_space<vmem>>, vector<128x128xbf16>
    %c0_1 = arith.constant 0 : index
    %c0_2 = arith.constant 0 : index
    %1 = vector.load %arg1[%c0_1, %c0_2] : memref<128x128xbf16, #tpu.memory_space<vmem>>, vector<128x128xbf16>
    %c0_3 = arith.constant 0 : index
    %c0_4 = arith.constant 0 : index
    %2 = vector.load %arg2[%c0_3, %c0_4] : memref<128x128xbf16, #tpu.memory_space<vmem>>, vector<128x128xbf16>
    %c0_5 = arith.constant 0 : index
    %c0_6 = arith.constant 0 : index
    %3 = vector.load %arg3[%c0_5, %c0_6] : memref<128x128xbf16, #tpu.memory_space<vmem>>, vector<128x128xbf16>
    %cst = arith.constant dense<0.000000e+00> : vector<128x128xf32>
    %4 = tpu.matmul %1, %0, %cst {dimension_numbers = #tpu.dot_dimension_numbers<[1], [0], [0], [1], [0, 0, 1, 1], [], []>} : vector<128x128xbf16>, vector<128x128xbf16>, vector<128x128xf32> -> vector<128x128xf32>
    %5 = arith.truncf %4 : vector<128x128xf32> to vector<128x128xbf16>
    %cst_7 = arith.constant dense<0.000000e+00> : vector<128x128xf32>
    %6 = tpu.matmul %5, %2, %cst_7 {dimension_numbers = #tpu.dot_dimension_numbers<[1], [0], [0], [1], [0, 0, 1, 1], [], []>} : vector<128x128xbf16>, vector<128x128xbf16>, vector<128x128xf32> -> vector<128x128xf32>
    %7 = math.tanh %6 : vector<128x128xf32>
    %8 = arith.truncf %7 : vector<128x128xf32> to vector<128x128xbf16>
    %cst_8 = arith.constant dense<0.000000e+00> : vector<128x128xf32>
    %9 = tpu.matmul %1, %8, %cst_8 {dimension_numbers = #tpu.dot_dimension_numbers<[1], [0], [0], [1], [0, 0, 1, 1], [], []>} : vector<128x128xbf16>, vector<128x128xbf16>, vector<128x128xf32> -> vector<128x128xf32>
    %10 = arith.truncf %9 : vector<128x128xf32> to vector<128x128xbf16>
    %cst_9 = arith.constant dense<0.000000e+00> : vector<128x128xf32>
    %11 = tpu.matmul %10, %3, %cst_9 {dimension_numbers = #tpu.dot_dimension_numbers<[1], [0], [0], [1], [0, 0, 1, 1], [], []>} : vector<128x128xbf16>, vector<128x128xbf16>, vector<128x128xf32> -> vector<128x128xf32>
    %12 = math.tanh %11 : vector<128x128xf32>
    %13 = tpu.iota {dimensions = array<i32: 0>} : vector<128x128xi32>
    %c8_i32 = arith.constant 8 : i32
    %14 = vector.broadcast %c8_i32 : i32 to vector<128x128xi32>
    %15 = arith.cmpi slt, %13, %14 : vector<128x128xi32>
    %cst_10 = arith.constant 0.000000e+00 : f32
    %16 = vector.broadcast %cst_10 : f32 to vector<128x128xf32>
    %17 = arith.select %15, %12, %16 : vector<128x128xi1>, vector<128x128xf32>
    %cst_11 = arith.constant dense<0.000000e+00> : vector<128xf32>
    %18 = vector.multi_reduction <add>, %17, %cst_11 [0] : vector<128x128xf32> to vector<128xf32>
    %19 = vector.shape_cast %18 : vector<128xf32> to vector<1x128xf32>
    %cst_12 = arith.constant 0xFF800000 : f32
    %20 = vector.broadcast %cst_12 : f32 to vector<128x128xf32>
    %21 = arith.select %15, %12, %20 : vector<128x128xi1>, vector<128x128xf32>
    %cst_13 = arith.constant dense<0xFF800000> : vector<128xf32>
    %22 = vector.multi_reduction <maximumf>, %21, %cst_13 [0] : vector<128x128xf32> to vector<128xf32>
    %23 = vector.shape_cast %22 : vector<128xf32> to vector<1x128xf32>
    %cst_14 = arith.constant 1.250000e-01 : f32
    %24 = vector.broadcast %cst_14 : f32 to vector<1x128xf32>
    %25 = arith.mulf %19, %24 : vector<1x128xf32>
    %26 = tpu.iota {dimensions = array<i32: 0>} : vector<8x128xi32>
    %c0_i32 = arith.constant 0 : i32
    %27 = vector.broadcast %c0_i32 : i32 to vector<8x128xi32>
    %28 = arith.cmpi eq, %26, %27 : vector<8x128xi32>
    %29 = vector.shape_cast %25 : vector<1x128xf32> to vector<1x128xf32>
    %30 = vector.broadcast %29 : vector<1x128xf32> to vector<8x128xf32>
    %31 = vector.shape_cast %23 : vector<1x128xf32> to vector<1x128xf32>
    %32 = vector.broadcast %31 : vector<1x128xf32> to vector<8x128xf32>
    %33 = arith.select %28, %30, %32 : vector<8x128xi1>, vector<8x128xf32>
    %c0_15 = arith.constant 0 : index
    %c0_16 = arith.constant 0 : index
    %34 = vector.load %arg4[%c0_15, %c0_16] : memref<8x128xf32, #tpu.memory_space<vmem>>, vector<8x128xf32>
    tpu.vector_store %arg4[%c0_15, %c0_16], %33 {strides = array<i32>} : memref<8x128xf32, #tpu.memory_space<vmem>>, vector<8x128xf32>,
    return
  }
}

</mosaic_0001>

<bundles_post_ra>
// kernel: forward.1
= control target key start
LH: loop header
LB: loop body
LE: loop exit
PB: predicated region body
PF: predicated region fallthrough
CT: control target
= control target key end

     0   :  { %s1275_s0 = inlined_call_operand.vmem [shape: bf16[128,128], index: 0, kind: input, shape index: {}]   ;;  %s1276_s1 = inlined_call_operand.vmem [shape: bf16[128,128], index: 1, kind: input, shape index: {}]   ;;  %s1277_s2 = inlined_call_operand.vmem [shape: bf16[128,128], index: 2, kind: input, shape index: {}]   ;;  %s1278_s3 = inlined_call_operand.vmem [shape: bf16[128,128], index: 3, kind: input, shape index: {}]   ;;  %s1279_s4 = inlined_call_operand.vmem [shape: f32[8,128], index: 4, kind: output, shape index: {}]  }
   0x1   :  { %v1057_v0 = vld [vmem:[%s1275_s0] sm:$0xff]   ;;  %v1058_v1 = vld [vmem:[%s1275_s0 + $0x8] sm:$0xff]   ;;  %v1059_v2 = vld [vmem:[%s1275_s0 + $0x10] sm:$0xff]  }
   0x2   :  { %929 = vmatprep.subr.bf16.mxu0 %v1057_v0  ;;  %v1060_v3 = vld [vmem:[%s1275_s0 + $0x18] sm:$0xff]   ;;  %v1065_v4 = vld [vmem:[%s1276_s1] sm:$0xff]   ;;  %v1062_v6 = vld [vmem:[%s1275_s0 + $0x28] sm:$0xff]  }
   0x3   :  { %930 = vmatpush3.bf16.msra.mxu0 %v1057_v0  ;;  %945 = vmatprep.mubr.bf16.mxu0 %v1065_v4  ;;  %v1061_v5 = vld [vmem:[%s1275_s0 + $0x20] sm:$0xff]   ;;  %v1074_v8 = vld [vmem:[%s1277_s2 + $0x8] sm:$0xff]   ;;  %v1063_v9 = vld [vmem:[%s1275_s0 + $0x30] sm:$0xff]  }
   0x4   :  { %931 = vmatprep.subr.bf16.mxu0 %v1058_v1  ;;  %v1073_v7 = vld [vmem:[%s1277_s2] sm:$0xff]   ;;  %v1075_v10 = vld [vmem:[%s1277_s2 + $0x10] sm:$0xff]   ;;  %v1064_v11 = vld [vmem:[%s1275_s0 + $0x38] sm:$0xff]  }
   0x5   :  { %961 = vmatprep.subr.bf16.mxu1 %v1073_v7  ;;  %v1076_v12 = vld [vmem:[%s1277_s2 + $0x18] sm:$0xff]   ;;  %v1077_v13 = vld [vmem:[%s1277_s2 + $0x20] sm:$0xff]   ;;  %v1193_v14 = vld [vmem:[%s1276_s1 + $0x8] sm:$0xff]  }
   0x6   :  { %962 = vmatpush3.bf16.msra.mxu1 %v1073_v7  ;;  %v1198_v15 = vld [vmem:[%s1276_s1 + $0x10] sm:$0xff]   ;;  %v1078_v16 = vld [vmem:[%s1277_s2 + $0x28] sm:$0xff]   ;;  %v1211_v18 = vld [vmem:[%s1276_s1 + $0x18] sm:$0xff]  }
   0x7   :  { %932 = vmatpush3.bf16.msra.mxu0 %v1058_v1  ;;  %963 = vmatprep.subr.bf16.mxu1 %v1074_v8  ;;  %v1079_v17 = vld [vmem:[%s1277_s2 + $0x30] sm:$0xff]   ;;  %v1216_v19 = vld [vmem:[%s1276_s1 + $0x20] sm:$0xff]   ;;  %v1223_v20 = vld [vmem:[%s1276_s1 + $0x28] sm:$0xff]  }
   0x8   :  { %933 = vmatprep.subr.bf16.mxu0 %v1059_v2  ;;  %v1228_v21 = vld [vmem:[%s1276_s1 + $0x30] sm:$0xff]   ;;  %v1235_v22 = vld [vmem:[%s1276_s1 + $0x38] sm:$0xff]   ;;  %v1081_v48 = vld [vmem:[%s1278_s3] sm:$0xff]  }
   0x9   :  { %v1080_v23 = vld [vmem:[%s1277_s2 + $0x38] sm:$0xff]   ;;  %v1082_v49 = vld [vmem:[%s1278_s3 + $0x8] sm:$0xff]   ;;  %v1083_v50 = vld [vmem:[%s1278_s3 + $0x10] sm:$0xff]  }
   0xa   :  { %964 = vmatpush3.bf16.msra.mxu1 %v1074_v8  ;;  %v1084_v51 = vld [vmem:[%s1278_s3 + $0x18] sm:$0xff]   ;;  %v1085_v52 = vld [vmem:[%s1278_s3 + $0x20] sm:$0xff]   ;;  %v1086_v53 = vld [vmem:[%s1278_s3 + $0x28] sm:$0xff]  }
   0xb   :  { %934 = vmatpush3.bf16.msra.mxu0 %v1059_v2  ;;  %965 = vmatprep.subr.bf16.mxu1 %v1075_v10  ;;  %v1087_v54 = vld [vmem:[%s1278_s3 + $0x30] sm:$0xff]  }
   0xc   :  { %935 = vmatprep.subr.bf16.mxu0 %v1060_v3 }
   0xe   :  { %966 = vmatpush3.bf16.msra.mxu1 %v1075_v10 }
   0xf   :  { %936 = vmatpush3.bf16.msra.mxu0 %v1060_v3  ;;  %967 = vmatprep.subr.bf16.mxu1 %v1076_v12 }
  0x10   :  { %937 = vmatprep.subr.bf16.mxu0 %v1061_v5 }
  0x12   :  { %968 = vmatpush3.bf16.msra.mxu1 %v1076_v12 }
  0x13   :  { %938 = vmatpush3.bf16.msra.mxu0 %v1061_v5  ;;  %969 = vmatprep.subr.bf16.mxu1 %v1077_v13 }
  0x14   :  { %939 = vmatprep.subr.bf16.mxu0 %v1062_v6 }
  0x16   :  { %970 = vmatpush3.bf16.msra.mxu1 %v1077_v13 }
  0x17   :  { %940 = vmatpush3.bf16.msra.mxu0 %v1062_v6  ;;  %971 = vmatprep.subr.bf16.mxu1 %v1078_v16 }
  0x18   :  { %941 = vmatprep.subr.bf16.mxu0 %v1063_v9 }
  0x1a   :  { %972 = vmatpush3.bf16.msra.mxu1 %v1078_v16 }
  0x1b   :  { %942 = vmatpush3.bf16.msra.mxu0 %v1063_v9  ;;  %973 = vmatprep.subr.bf16.mxu1 %v1079_v17 }
  0x1c   :  { %943 = vmatprep.subr.bf16.mxu0 %v1064_v11 }
  0x1e   :  { %974 = vmatpush3.bf16.msra.mxu1 %v1079_v17 }
  0x1f   :  { %944 = vmatpush3.bf16.msra.mxu0 %v1064_v11  ;;  %975 = vmatprep.subr.bf16.mxu1 %v1080_v23 }
  0x22   :  { %946 = vmatmul.mubr.bf16.vlgmr.msra.gmra.mrb[0].mxu0 %v1193_v14  ;;  %976 = vmatpush3.bf16.msra.mxu1 %v1080_v23 }
  0x23   :  { %949 = vmatprep.mubr.bf16.mxu0 %v1198_v15  ;;  %1025 = vmatprep.subr.bf16.mxu1 %v1081_v48 }
  0x2a   :  { %950 = vmatmul.mubr.bf16.gmra.mrb[4].mxu0 %v1211_v18 }
  0x2b   :  { %953 = vmatprep.mubr.bf16.mxu0 %v1216_v19 }
  0x32   :  { %954 = vmatmul.mubr.bf16.gmra.mrb[8].mxu0 %v1223_v20 }
  0x33   :  { %957 = vmatprep.mubr.bf16.mxu0 %v1228_v21 }
  0x3a   :  { %958 = vmatmul.mubr.bf16.gmra.mrb[12].mxu0 %v1235_v22 }
  0x3b   :  { %1009 = vmatprep.mubr.bf16.mxu0 %v1065_v4 }
  0xf5   :  { %v947_v24 = vpop.f32.mrb[0].mxu0 }
  0xf6   :  { %v212_v25 = vpop.f32.mrb[1].mxu0 }
  0xf7   :  { %v948_v26 = vpop.f32.mrb[2].mxu0 }
  0xf8   :  { %v276_v27 = vpack.c.bf16 %v948_v26, %v947_v24  ;;  %v215_v28 = vpop.f32.mrb[3].mxu0 }
  0xf9   :  { %v275_v29 = vpack.c.bf16 %v215_v28, %v212_v25 }
  0xfb   :  { %977 = vmatprep.mubr.bf16.mxu1 %v275_v29 }
  0xfc   :  { %978 = vmatmul.mubr.bf16.vlgmr.msra.gmra.mrb[0].mxu1 %v276_v27 }
  0xfd   :  { %v951_v30 = vpop.f32.mrb[4].mxu0  ;;  %1026 = vmatpush3.bf16.msra.mxu1 %v1081_v48 }
  0xfe   :  { %v228_v31 = vpop.f32.mrb[5].mxu0  ;;  %1027 = vmatprep.subr.bf16.mxu1 %v1082_v49 }
  0xff   :  { %v952_v32 = vpop.f32.mrb[6].mxu0 }
 0x100   :  { %v278_v33 = vpack.c.bf16 %v952_v32, %v951_v30  ;;  %v231_v34 = vpop.f32.mrb[7].mxu0 }
 0x101   :  { %v277_v35 = vpack.c.bf16 %v231_v34, %v228_v31  ;;  %1028 = vmatpush3.bf16.msra.mxu1 %v1082_v49 }
 0x102   :  { %1029 = vmatprep.subr.bf16.mxu1 %v1083_v50 }
 0x103   :  { %981 = vmatprep.mubr.bf16.mxu1 %v277_v35 }
 0x104   :  { %982 = vmatmul.mubr.bf16.gmra.mrb[4].mxu1 %v278_v33 }
 0x105   :  { %v955_v36 = vpop.f32.mrb[8].mxu0  ;;  %1030 = vmatpush3.bf16.msra.mxu1 %v1083_v50 }
 0x106   :  { %v244_v37 = vpop.f32.mrb[9].mxu0  ;;  %1031 = vmatprep.subr.bf16.mxu1 %v1084_v51 }
 0x107   :  { %v956_v38 = vpop.f32.mrb[10].mxu0 }
 0x108   :  { %v280_v39 = vpack.c.bf16 %v956_v38, %v955_v36  ;;  %v247_v40 = vpop.f32.mrb[11].mxu0  ;;  %v1088_v38 = vld [vmem:[%s1278_s3 + $0x38] sm:$0xff]  }
 0x109   :  { %v279_v41 = vpack.c.bf16 %v247_v40, %v244_v37  ;;  %1032 = vmatpush3.bf16.msra.mxu1 %v1084_v51 }
 0x10a   :  { %1033 = vmatprep.subr.bf16.mxu1 %v1085_v52 }
 0x10b   :  { %985 = vmatprep.mubr.bf16.mxu1 %v279_v41 }
 0x10c   :  { %986 = vmatmul.mubr.bf16.gmra.mrb[8].mxu1 %v280_v39 }
 0x10d   :  { %v959_v42 = vpop.f32.mrb[12].mxu0  ;;  %1034 = vmatpush3.bf16.msra.mxu1 %v1085_v52 }
 0x10e   :  { %v260_v43 = vpop.f32.mrb[13].mxu0  ;;  %1035 = vmatprep.subr.bf16.mxu1 %v1086_v53 }
 0x10f   :  { %v960_v44 = vpop.f32.mrb[14].mxu0 }
 0x110   :  { %v282_v45 = vpack.c.bf16 %v960_v44, %v959_v42  ;;  %v263_v46 = vpop.f32.mrb[15].mxu0 }
 0x111   :  { %v281_v47 = vpack.c.bf16 %v263_v46, %v260_v43  ;;  %1036 = vmatpush3.bf16.msra.mxu1 %v1086_v53 }
 0x112   :  { %1037 = vmatprep.subr.bf16.mxu1 %v1087_v54 }
 0x113   :  { %989 = vmatprep.mubr.bf16.mxu1 %v281_v47 }
 0x114   :  { %990 = vmatmul.mubr.bf16.gmra.mrb[12].mxu1 %v282_v45 }
 0x115   :  { %1038 = vmatpush3.bf16.msra.mxu1 %v1087_v54 }
 0x116   :  { %1039 = vmatprep.subr.bf16.mxu1 %v1088_v38 }
 0x119   :  { %1040 = vmatpush3.bf16.msra.mxu1 %v1088_v38 }
 0x1cf   :  { %v979_v55 = vpop.f32.mrb[0].mxu1 }
 0x1d0   :  { %1089 = vtanh.f32 %v979_v55  ;;  %v365_v56 = vpop.f32.mrb[1].mxu1 }
 0x1d1   :  { %1091 = vtanh.f32 %v365_v56  ;;  %v980_v57 = vpop.f32.mrb[2].mxu1 }
 0x1d2   :  { %1093 = vtanh.f32 %v980_v57  ;;  %v368_v58 = vpop.f32.mrb[3].mxu1 }
 0x1d3   :  { %1095 = vtanh.f32 %v368_v58 }
 0x1d7   :  { %v983_v59 = vpop.f32.mrb[4].mxu1 }
 0x1d8   :  { %1097 = vtanh.f32 %v983_v59  ;;  %v381_v60 = vpop.f32.mrb[5].mxu1 }
 0x1d9   :  { %1099 = vtanh.f32 %v381_v60  ;;  %v984_v61 = vpop.f32.mrb[6].mxu1 }
 0x1da   :  { %v1090_v62 = vpop.eup %1089  ;;  %1101 = vtanh.f32 %v984_v61  ;;  %v384_v63 = vpop.f32.mrb[7].mxu1 }
 0x1db   :  { %v1092_v0 = vpop.eup %1091  ;;  %1103 = vtanh.f32 %v384_v63 }
 0x1dc   :  { %v1094_v1 = vpop.eup %1093 }
 0x1dd   :  { %v1096_v2 = vpop.eup %1095  ;;  %v445_v3 = vpack.c.bf16 %v1094_v1, %v1090_v62 }
 0x1de   :  { %v444_v4 = vpack.c.bf16 %v1096_v2, %v1092_v0 }
 0x1df   :  { %v987_v5 = vpop.f32.mrb[8].mxu1 }
 0x1e0   :  { %1105 = vtanh.f32 %v987_v5  ;;  %v397_v6 = vpop.f32.mrb[9].mxu1  ;;  %993 = vmatprep.subr.bf16.mxu0 %v444_v4 }
 0x1e1   :  { %1107 = vtanh.f32 %v397_v6  ;;  %v988_v7 = vpop.f32.mrb[10].mxu1  ;;  %994 = vmatpush3.bf16.msra.mxu0 %v444_v4  ;;  %v718_v4 = vlaneseq }
 0x1e2   :  { %v1098_v8 = vpop.eup %1097  ;;  %1109 = vtanh.f32 %v988_v7  ;;  %v400_v9 = vpop.f32.mrb[11].mxu1  ;;  %995 = vmatprep.subr.bf16.mxu0 %v445_v3 }
 0x1e3   :  { %v1100_v10 = vpop.eup %1099  ;;  %1111 = vtanh.f32 %v400_v9 }
 0x1e4   :  { %v1102_v11 = vpop.eup %1101 }
 0x1e5   :  { %v1104_v12 = vpop.eup %1103  ;;  %996 = vmatpush3.bf16.msra.mxu0 %v445_v3  ;;  %v447_v13 = vpack.c.bf16 %v1102_v11, %v1098_v8 }
 0x1e6   :  { %v446_v16 = vpack.c.bf16 %v1104_v12, %v1100_v10 }
 0x1e7   :  { %v991_v17 = vpop.f32.mrb[12].mxu1 }
 0x1e8   :  { %1113 = vtanh.f32 %v991_v17  ;;  %v413_v23 = vpop.f32.mrb[13].mxu1  ;;  %997 = vmatprep.subr.bf16.mxu0 %v446_v16 }
 0x1e9   :  { %1115 = vtanh.f32 %v413_v23  ;;  %v992_v24 = vpop.f32.mrb[14].mxu1  ;;  %998 = vmatpush3.bf16.msra.mxu0 %v446_v16 }
 0x1ea   :  { %v1106_v25 = vpop.eup %1105  ;;  %1117 = vtanh.f32 %v992_v24  ;;  %v416_v26 = vpop.f32.mrb[15].mxu1  ;;  %999 = vmatprep.subr.bf16.mxu0 %v447_v13 }
 0x1eb   :  { %v1108_v27 = vpop.eup %1107  ;;  %1119 = vtanh.f32 %v416_v26 }
 0x1ec   :  { %v1110_v28 = vpop.eup %1109 }
 0x1ed   :  { %v1112_v29 = vpop.eup %1111  ;;  %1000 = vmatpush3.bf16.msra.mxu0 %v447_v13  ;;  %v449_v30 = vpack.c.bf16 %v1110_v28, %v1106_v25  ;;  %v719_v13 = vshrl.u32 %v718_v4, 7 }
 0x1ee   :  { %v448_v31 = vpack.c.bf16 %v1112_v29, %v1108_v27 }
 0x1ef   :  { %vm826_vm0 = vcmp.eq.s32.totalorder %v719_v13, 0 }
 0x1f0   :  { %1001 = vmatprep.subr.bf16.mxu0 %v448_v31 }
 0x1f1   :  { %1002 = vmatpush3.bf16.msra.mxu0 %v448_v31 }
 0x1f2   :  { %v1114_v32 = vpop.eup %1113  ;;  %1003 = vmatprep.subr.bf16.mxu0 %v449_v30 }
 0x1f3   :  { %v1116_v33 = vpop.eup %1115 }
 0x1f4   :  { %v1118_v34 = vpop.eup %1117 }
 0x1f5   :  { %v1120_v35 = vpop.eup %1119  ;;  %1004 = vmatpush3.bf16.msra.mxu0 %v449_v30  ;;  %v451_v36 = vpack.c.bf16 %v1118_v34, %v1114_v32 }
 0x1f6   :  { %v450_v37 = vpack.c.bf16 %v1120_v35, %v1116_v33 }
 0x1f8   :  { %1005 = vmatprep.subr.bf16.mxu0 %v450_v37 }
 0x1f9   :  { %1006 = vmatpush3.bf16.msra.mxu0 %v450_v37 }
 0x1fa   :  { %1007 = vmatprep.subr.bf16.mxu0 %v451_v36 }
 0x1fd   :  { %1008 = vmatpush3.bf16.msra.mxu0 %v451_v36 }
 0x200   :  { %1010 = vmatmul.mubr.bf16.vlgmr.msra.gmra.mrb[16].mxu0 %v1193_v14 }
 0x201   :  { %1013 = vmatprep.mubr.bf16.mxu0 %v1198_v15 }
 0x208   :  { %1014 = vmatmul.mubr.bf16.gmra.mrb[20].mxu0 %v1211_v18 }
 0x209   :  { %1017 = vmatprep.mubr.bf16.mxu0 %v1216_v19 }
 0x210   :  { %1018 = vmatmul.mubr.bf16.gmra.mrb[24].mxu0 %v1223_v20 }
 0x211   :  { %1021 = vmatprep.mubr.bf16.mxu0 %v1228_v21 }
 0x218   :  { %1022 = vmatmul.mubr.bf16.gmra.mrb[28].mxu0 %v1235_v22 }
 0x2d3   :  { %v1011_v39 = vpop.f32.mrb[16].mxu0 }
 0x2d4   :  { %v486_v14 = vpop.f32.mrb[17].mxu0 }
 0x2d5   :  { %v1012_v40 = vpop.f32.mrb[18].mxu0 }
 0x2d6   :  { %v550_v15 = vpack.c.bf16 %v1012_v40, %v1011_v39  ;;  %v489_v41 = vpop.f32.mrb[19].mxu0 }
 0x2d7   :  { %v549_v18 = vpack.c.bf16 %v489_v41, %v486_v14 }
 0x2d9   :  { %1041 = vmatprep.mubr.bf16.mxu1 %v549_v18 }
 0x2da   :  { %1042 = vmatmul.mubr.bf16.vlgmr.msra.gmra.mrb[16].mxu1 %v550_v15 }
 0x2db   :  { %v1015_v19 = vpop.f32.mrb[20].mxu0 }
 0x2dc   :  { %v502_v20 = vpop.f32.mrb[21].mxu0 }
 0x2dd   :  { %v1016_v42 = vpop.f32.mrb[22].mxu0 }
 0x2de   :  { %v552_v21 = vpack.c.bf16 %v1016_v42, %v1015_v19  ;;  %v505_v43 = vpop.f32.mrb[23].mxu0 }
 0x2df   :  { %v551_v22 = vpack.c.bf16 %v505_v43, %v502_v20 }
 0x2e1   :  { %1045 = vmatprep.mubr.bf16.mxu1 %v551_v22 }
 0x2e2   :  { %1046 = vmatmul.mubr.bf16.gmra.mrb[20].mxu1 %v552_v21 }
 0x2e3   :  { %v1019_v44 = vpop.f32.mrb[24].mxu0 }
 0x2e4   :  { %v518_v45 = vpop.f32.mrb[25].mxu0 }
 0x2e5   :  { %v1020_v46 = vpop.f32.mrb[26].mxu0 }
 0x2e6   :  { %v554_v47 = vpack.c.bf16 %v1020_v46, %v1019_v44  ;;  %v521_v48 = vpop.f32.mrb[27].mxu0 }
 0x2e7   :  { %v553_v49 = vpack.c.bf16 %v521_v48, %v518_v45 }
 0x2e9   :  { %1049 = vmatprep.mubr.bf16.mxu1 %v553_v49 }
 0x2ea   :  { %1050 = vmatmul.mubr.bf16.gmra.mrb[24].mxu1 %v554_v47 }
 0x2eb   :  { %v1023_v50 = vpop.f32.mrb[28].mxu0 }
 0x2ec   :  { %v534_v51 = vpop.f32.mrb[29].mxu0 }
 0x2ed   :  { %v1024_v52 = vpop.f32.mrb[30].mxu0 }
 0x2ee   :  { %v556_v53 = vpack.c.bf16 %v1024_v52, %v1023_v50  ;;  %v537_v54 = vpop.f32.mrb[31].mxu0 }
 0x2ef   :  { %v555_v55 = vpack.c.bf16 %v537_v54, %v534_v51 }
 0x2f1   :  { %1053 = vmatprep.mubr.bf16.mxu1 %v555_v55 }
 0x2f2   :  { %1054 = vmatmul.mubr.bf16.gmra.mrb[28].mxu1 %v556_v53 }
 0x3ad   :  { %v1043_v56 = vpop.f32.mrb[16].mxu1 }
 0x3ae   :  { %v639_v57 = vpop.f32.mrb[17].mxu1 }
 0x3af   :  { %1121 = vtanh.f32 %v639_v57  ;;  %v1044_v58 = vpop.f32.mrb[18].mxu1 }
 0x3b0   :  { %v642_v59 = vpop.f32.mrb[19].mxu1 }
 0x3b5   :  { %v1047_v60 = vpop.f32.mrb[20].mxu1 }
 0x3b6   :  { %v655_v61 = vpop.f32.mrb[21].mxu1 }
 0x3b7   :  { %v1048_v62 = vpop.f32.mrb[22].mxu1 }
 0x3b8   :  { %v658_v63 = vpop.f32.mrb[23].mxu1 }
 0x3b9   :  { %v1122_v0 = vpop.eup %1121 }
 0x3ba   :  { %v782_v1 = vrot.slane %v1122_v0, 4 }
 0x3bc   :  { %v783_v2 = vadd.f32 %v1122_v0, %v782_v1  ;;  %v820_v3 = vmax.f32 %v1122_v0, %v782_v1 }
 0x3bd   :  { %v1051_v5 = vpop.f32.mrb[24].mxu1 }
 0x3be   :  { %v784_v6 = vrot.slane %v783_v2, 2  ;;  %v821_v7 = vrot.slane %v820_v3, 2  ;;  %v671_v8 = vpop.f32.mrb[25].mxu1 }
 0x3bf   :  { %v1052_v9 = vpop.f32.mrb[26].mxu1 }
 0x3c0   :  { %v785_v10 = vadd.f32 %v784_v6, %v783_v2  ;;  %v822_v11 = vmax.f32 %v820_v3, %v821_v7  ;;  %v674_v12 = vpop.f32.mrb[27].mxu1 }
 0x3c2   :  { %v786_v16 = vrot.slane %v785_v10, 1  ;;  %v823_v17 = vrot.slane %v822_v11, 1 }
 0x3c4   :  { %v787_v23 = vadd.f32 %v786_v16, %v785_v10  ;;  %v824_v25 = vmax.f32 %v822_v11, %v823_v17 }
 0x3c5   :  { %v1055_v24 = vpop.f32.mrb[28].mxu1 }
 0x3c6   :  { %v825_v26 = vmul.f32 0.125, %v787_v23  ;;  %v687_v27 = vpop.f32.mrb[29].mxu1 }
 0x3c7   :  { %v1056_v28 = vpop.f32.mrb[30].mxu1 }
 0x3c8   :  { %v827_v29 = vsel %vm826_vm0, %v825_v26, %v824_v25  ;;  %v690_v30 = vpop.f32.mrb[31].mxu1 }
 0x3c9   :  { %828 = vst [vmem:[%s1279_s4] sm:$0xff] %v827_v29 }

</bundles_post_ra>
